<compile_context>
chip_gen: v7x
topology: tpu7x:2x2x1
jax: 0.10.0
libtpu: 0.0.40
codegen_flags: <defaults>
</compile_context>

<pallas_src>
import jax
import jax.numpy as jnp
from jax.experimental import pallas as pl
from jax.experimental.pallas import tpu as pltpu


# Canonical BYOL usage: LambdaModule(lambda x: x) replaces a backbone head.
_IDENTITY = lambda t: t

_TARGET_BLOCK_BYTES = 8 * 1024 * 1024   # ~8 MiB per block (amortizes ~0.35us/step)
_VMEM_LIMIT_BYTES = 48 * 1024 * 1024    # 4 x 8 MiB double-buffers + headroom (< 64 MiB v7x)
_MIN_PALLAS_BYTES = 1 << 20             # below ~1 MiB, fused XLA elementwise wins
_MAX_LANE = 1024                        # lane-dense last dim (multiple of 128)


def _round_up(n: int, m: int) -> int:
    return ((n + m - 1) // m) * m


def _sublane_multiple(dtype) -> int:
    # (8,128) f32 / (16,128) bf16 / (32,128) int8-fp8 minimum tiles.
    itemsize = jnp.dtype(dtype).itemsize
    return max(8, 32 // itemsize)


def _make_kernel(lam):
    def _kernel(x_ref, o_ref):
        # Elementwise lambda applied on the VMEM-resident tile.
        o_ref[...] = lam(x_ref[...]).astype(o_ref.dtype)
    return _kernel


def _pallas_elementwise_2d(x2d, lam, out_dtype, block_rows, donate):
    rows, lane = x2d.shape
    grid = (pl.cdiv(rows, block_rows),)
    bytes_in = x2d.size * x2d.dtype.itemsize
    bytes_out = x2d.size * jnp.dtype(out_dtype).itemsize

    kwargs = {}
    if donate and x2d.dtype == jnp.dtype(out_dtype):
        # Only alias when the caller explicitly donates x (otherwise XLA would
        # insert a defensive full copy, an extra HBM pass on a mem-bound op).
        kwargs["input_output_aliases"] = {0: 0}

    return pl.pallas_call(
        _make_kernel(lam),
        out_shape=jax.ShapeDtypeStruct((rows, lane), out_dtype),
        grid_spec=pltpu.PrefetchScalarGridSpec(
            num_scalar_prefetch=0,
            grid=grid,
            in_specs=[pl.BlockSpec((block_rows, lane), lambda i: (i, 0))],
            out_specs=pl.BlockSpec((block_rows, lane), lambda i: (i, 0)),
        ),
        cost_estimate=pl.CostEstimate(
            flops=0, transcendentals=0, bytes_accessed=bytes_in + bytes_out),
        compiler_params=pltpu.CompilerParams(
            dimension_semantics=("parallel",),   # megacore split on v7x
            vmem_limit_bytes=_VMEM_LIMIT_BYTES,
        ),
        **kwargs,
    )(x2d)


def lambda_module_forward(x: jax.Array, lam=_IDENTITY, *,
                          force_pallas: bool = False,
                          donate: bool = False) -> jax.Array:
    """Pallas implementation of LambdaModule(lam).forward(x) for elementwise lam."""
    # --- fast paths ---------------------------------------------------------
    if not force_pallas and lam is _IDENTITY:
        # Identity lambda: forward is a no-op — no HBM round-trip at all.
        return x

    # Trace-time check: only shape-preserving (elementwise-style) lambdas have
    # a generic Pallas translation; anything else falls back to plain lam(x).
    out_aval = jax.eval_shape(lam, jax.ShapeDtypeStruct(x.shape, x.dtype))
    if out_aval.shape != x.shape:
        # TODO(synk): shape-changing / position-mixing lambdas need op-specific kernels.
        return lam(x)
    out_dtype = out_aval.dtype

    n = x.size
    nbytes = n * x.dtype.itemsize
    if not force_pallas and nbytes < _MIN_PALLAS_BYTES:
        # Tiny tensors: launch + per-step overhead dominates; fused XLA wins.
        return lam(x)

    orig_shape = x.shape
    sub = _sublane_multiple(x.dtype)

    # --- lane-dense layout without materializing a pad when possible --------
    if n % 128 == 0:
        lane = 128
        for cand in range(_MAX_LANE, 127, -128):
            if n % cand == 0:
                lane = cand
                break
        x2d = x.reshape(n // lane, lane)   # free: contiguous flatten (bitcast)
        pad = 0
    else:
        # Rare odd total size: minimal pad to one 128-lane row multiple.
        # (Padded zeros flow through lam and are discarded by the final slice.)
        lane = 128
        n_padded = _round_up(n, lane)
        pad = n_padded - n
        x2d = jnp.pad(x.reshape(-1), (0, pad)).reshape(n_padded // lane, lane)

    rows = x2d.shape[0]

    # --- byte-targeted, dtype-aware block rows -------------------------------
    itemsize = x.dtype.itemsize
    target_rows = max(sub, (_TARGET_BLOCK_BYTES // (lane * itemsize)) // sub * sub)
    if rows <= sub:
        # Full-extent block (satisfies the "equal to full array dims" rule).
        block_rows = rows
    else:
        # Cap at ~rows/2 (rounded to the sublane multiple) so the grid has at
        # least 2 steps and both v7x TensorCores participate.
        half = _round_up(pl.cdiv(rows, 2), sub)
        block_rows = max(sub, min(target_rows, half))

    out2d = _pallas_elementwise_2d(x2d, lam, out_dtype, block_rows, donate)

    if pad:
        return out2d.reshape(-1)[:n].reshape(orig_shape)
    return out2d.reshape(orig_shape)


if __name__ == "__main__":
    key = jax.random.PRNGKey(0)
    # Small NCHW input consistent with a conv-net feature map.
    x = jax.random.normal(key, (2, 4, 16, 16), dtype=jnp.float32)

    # 1) Canonical BYOL identity lambda (fast path: zero-copy).
    y_id = jax.block_until_ready(lambda_module_forward(x))
    assert y_id.shape == x.shape and y_id.dtype == x.dtype
    assert bool(jnp.all(y_id == x))

    # 2) Identity lambda forced through the tiled Pallas kernel.
    y_pallas = jax.block_until_ready(lambda_module_forward(x, force_pallas=True))
    assert y_pallas.shape == x.shape and y_pallas.dtype == x.dtype
    assert bool(jnp.all(y_pallas == x))

    # 3) Generic elementwise lambda fused into the Pallas kernel (small, forced).
    lam = lambda t: t * 2.0 + 1.0
    y_lam = jax.block_until_ready(lambda_module_forward(x, lam, force_pallas=True))
    assert bool(jnp.allclose(y_lam, x * 2.0 + 1.0))

    # 4) Larger input (2 MiB) takes the natural Pallas path with a >=2-step grid.
    xb = jax.random.normal(jax.random.PRNGKey(1), (8, 64, 32, 32), dtype=jnp.float32)
    y_big = jax.block_until_ready(lambda_module_forward(xb, lam))
    assert bool(jnp.allclose(y_big, xb * 2.0 + 1.0))

    # 5) bf16 input exercises dtype-aware (16,128) sublane rounding.
    xh = xb.astype(jnp.bfloat16)
    y_h = jax.block_until_ready(lambda_module_forward(xh, lam, force_pallas=True))
    assert y_h.dtype == jnp.bfloat16 and y_h.shape == xh.shape

    # 6) Odd total size exercises the minimal-pad fallback path.
    xo = jax.random.normal(jax.random.PRNGKey(2), (3, 5, 7), dtype=jnp.float32)
    y_o = jax.block_until_ready(lambda_module_forward(xo, lam, force_pallas=True))
    assert bool(jnp.allclose(y_o, xo * 2.0 + 1.0))

    # 7) Shape-changing lambda falls back to plain XLA (no wrong-shape Pallas result).
    y_red = jax.block_until_ready(lambda_module_forward(x, lambda t: t.sum(axis=-1)))
    assert y_red.shape == x.shape[:-1]

    print("KERNEL_OK")
</pallas_src>

<mosaic_0001>
module attributes {stable_mosaic.version = 11 : i64} {
  func.func @_kernel(%arg0: i32, %arg1: memref<2x1024xf32, #tpu.memory_space<vmem>>, %arg2: memref<2x1024xf32, #tpu.memory_space<vmem>>) attributes {dimension_semantics = [#tpu.dimension_semantics<parallel>], iteration_bounds = array<i64: 1>, scalar_prefetch = 0 : i64, scratch_operands = 0 : i64, tpu.core_type = #tpu.core_type<tc>, window_params = [{transform_indices = @transform_0, window_bounds = array<i64: 2, 1024>}, {transform_indices = @transform_1, window_bounds = array<i64: 2, 1024>}]} {
    %c0 = arith.constant 0 : index
    %c0_0 = arith.constant 0 : index
    %0 = vector.load %arg1[%c0, %c0_0] : memref<2x1024xf32, #tpu.memory_space<vmem>>, vector<2x1024xf32>
    %c0_1 = arith.constant 0 : index
    %c0_2 = arith.constant 0 : index
    %1 = vector.load %arg2[%c0_1, %c0_2] : memref<2x1024xf32, #tpu.memory_space<vmem>>, vector<2x1024xf32>
    tpu.vector_store %arg2[%c0_1, %c0_2], %0 {strides = array<i32>} : memref<2x1024xf32, #tpu.memory_space<vmem>>, vector<2x1024xf32>,
    return
  }
  func.func @transform_0(%arg0: i32) -> (i32, i32) {
    %c0_i32 = arith.constant 0 : i32
    %c0_i32_0 = arith.constant 0 : i32
    return %arg0, %c0_i32 : i32, i32
  }
  func.func @transform_1(%arg0: i32) -> (i32, i32) {
    %c0_i32 = arith.constant 0 : i32
    %c0_i32_0 = arith.constant 0 : i32
    return %arg0, %c0_i32 : i32, i32
  }
}

</mosaic_0001>

<bundles_post_ra>
// kernel: tpu_custom_call.1
= control target key start
LH: loop header
LB: loop body
LE: loop exit
PB: predicated region body
PF: predicated region fallthrough
CT: control target
= control target key end

     0   :  { %6 = vsyncpa [#allocation3], 0  ;;  %s126_s0 = inlined_call_operand.hbm [shape: f32[2,1024], index: 0, kind: input, shape index: {}]   ;;  %s127_s1 = inlined_call_operand.hbm [shape: f32[2,1024], index: 1, kind: output, shape index: {}]  }
   0x1   :  { %7 = vsyncpa [#allocation4], 0  ;;  %s90_s6 = smov [#allocation2]   ;;  %s42_s10 = scalar_lea.hbm %s126_s0, 256 }
   0x2   :  { %s14_s7 = sshll.u32 %s90_s6, 4  ;;  %p43_p0 = scmp.ne.s32.totalorder %s126_s0, %s42_s10  ;;  %s15_s7 = int_to_ptr.vmem [resolvable:$true] %s14_s7 }
   0x3   :  { %p46_p1 = scmp.lt.u32.totalorder %s42_s10, %s126_s0 }
   0x5   :  { %p48_p2 = pnand %p46_p1, %p43_p0 }
   0x7   :  { %51 = shalt.err (!%p48_p2)
}
   0x8   :  { %s52_s15 = scalar_lea.vmem %s15_s7, 256  ;;  %p57_p4 = scmp.lt.s32.totalorder %s15_s7, %s15_s7 }
   0x9   :  { %p53_p3 = scmp.ne.s32.totalorder %s15_s7, %s52_s15  ;;  %p58_p5 = scmp.lt.s32.totalorder %s52_s15, %s52_s15 }
   0xb   :  { %p59_p6 = por %p58_p5, %p57_p4 }
   0xd   :  { %p60_p7 = pnand %p59_p6, %p53_p3 }
   0xf   :  { %63 = shalt.err (!%p60_p7)
}
  0x10   :  { %17 = dma.hbm_to_vmem [thread:$0]  %s126_s0, 256, %s15_s7, [#allocation3]  }
  0x11   :  { %86 = dma.done.wait [#allocation3], 256  }
  0x12   :  { %87 = vsyncadd [#allocation3], 4294967040  ;;  %s91_s18 = smov [#allocation5]   ;;  %v21_v0 = vld [vmem:[#allocation2] sm:$0xff]  ;;  %v22_v1 = vld [vmem:[#allocation2 + $0x8] sm:$0xff] }
  0x13   :  { %s31_s19 = sshll.u32 %s91_s18, 4  ;;  %23 = vst [vmem:[#allocation5] sm:$0xff] %v21_v0  ;;  %24 = vst [vmem:[#allocation5 + $0x8] sm:$0xff] %v22_v1  ;;  %s32_s19 = int_to_ptr.vmem [resolvable:$true] %s31_s19 }
  0x14   :  { %s64_s20 = scalar_lea.vmem %s32_s19, 256  ;;  %p69_p9 = scmp.lt.s32.totalorder %s32_s19, %s32_s19 }
  0x15   :  { %p65_p8 = scmp.ne.s32.totalorder %s32_s19, %s64_s20  ;;  %p70_p10 = scmp.lt.s32.totalorder %s64_s20, %s64_s20 }
  0x17   :  { %p71_p11 = por %p70_p10, %p69_p9 }
  0x19   :  { %p72_p12 = pnand %p71_p11, %p65_p8 }
  0x1b   :  { %75 = shalt.err (!%p72_p12)
}
  0x1c   :  { %s76_s0 = scalar_lea.hbm %s127_s1, 256 }
  0x1d   :  { %p77_p13 = scmp.ne.s32.totalorder %s127_s1, %s76_s0  ;;  %p80_p0 = scmp.lt.u32.totalorder %s76_s0, %s127_s1 }
  0x1f   :  { %p82_p1 = pnand %p80_p0, %p77_p13 }
  0x21   :  { %85 = shalt.err (!%p82_p1)
}
  0x22   :  { %34 = dma.vmem_to_hbm [thread:$0]  %s32_s19, 256, %s127_s1, [#allocation4]  }
  0x23   :  { %88 = dma.done.wait [#allocation4], 256  }
  0x24   :  { %89 = vsyncadd [#allocation4], 4294967040 }
  0x25   :  { %38 = vsyncpa [#allocation3], 1 }
  0x26   :  { %39 = vsyncpa [#allocation4], 1 }

</bundles_post_ra>
